<compile_context>
chip_gen: v5e
topology: v5e:2x2
jax: 0.10.0
libtpu: 0.0.40
codegen_flags: <defaults>
</compile_context>

<pallas_src>
import jax
import jax.numpy as jnp
from jax.experimental import pallas as pl
from jax.experimental.pallas import tpu as pltpu

INPUT_LEN = 804
H1, H2, H3 = 150, 70, 35
BN_EPS = 1e-5

# Padded (lane-aligned) sizes.
INPUT_PAD = 896   # round_up(804, 128)
H1_PAD = 256
H2_PAD = 128
H3_PAD = 128
OUT_PAD = 128


def _round_up(x, m):
    return ((x + m - 1) // m) * m


def _mlp_kernel(x_ref, w1_ref, b1_ref, w2_ref, b2_ref, w3_ref, b3_ref,
                wo_ref, bo_ref, o_ref):
    cdt = w1_ref.dtype  # compute dtype for MXU operands (bf16 or f32)

    # Layer 1: Linear(+folded BN) + ReLU
    h = jnp.dot(x_ref[...], w1_ref[...], preferred_element_type=jnp.float32)
    h = jnp.maximum(h + b1_ref[...], 0.0).astype(cdt)
    # Layer 2: Linear(+folded BN) + ReLU   (dropout = identity in eval)
    h = jnp.dot(h, w2_ref[...], preferred_element_type=jnp.float32)
    h = jnp.maximum(h + b2_ref[...], 0.0).astype(cdt)
    # Layer 3: Linear(+folded BN) + ReLU   (dropout = identity in eval)
    h = jnp.dot(h, w3_ref[...], preferred_element_type=jnp.float32)
    h = jnp.maximum(h + b3_ref[...], 0.0).astype(cdt)
    # Output layer
    y = jnp.dot(h, wo_ref[...], preferred_element_type=jnp.float32)
    o_ref[...] = (y + bo_ref[...]).astype(o_ref.dtype)


def _fold_bn(w, b, gamma, beta, mean, var):
    scale = gamma / jnp.sqrt(var + BN_EPS)          # (out,)
    return w * scale[None, :], (b - mean) * scale + beta


def _pad2(a, rows, cols):
    return jnp.pad(a, ((0, rows - a.shape[0]), (0, cols - a.shape[1])))


def neural_net_forward(x, params, *, batch_tile=512, compute_dtype=jnp.bfloat16):
    """x: (B, INPUT_LEN) f32.  Returns (B, 1) f32."""
    B = x.shape[0]
    # Clamp tile to (padded) batch so small batches don't over-allocate; keep a
    # multiple of 8 for sublane alignment.  On v7x keep batch_tile <= ~2048 so the
    # grid still has >=2 steps to shard across both TensorCores and the x double
    # buffer stays well under the 32 MiB scoped-VMEM default.
    bt = min(batch_tile, _round_up(B, 8))
    B_pad = _round_up(B, bt)

    w1, b1 = _fold_bn(params["w1"], params["b1"], *params["bn1"])
    w2, b2 = _fold_bn(params["w2"], params["b2"], *params["bn2"])
    w3, b3 = _fold_bn(params["w3"], params["b3"], *params["bn3"])

    # Zero-pad to lane-aligned shapes; cast MXU operands to the compute dtype.
    w1p = _pad2(w1, INPUT_PAD, H1_PAD).astype(compute_dtype)
    w2p = _pad2(w2, H1_PAD, H2_PAD).astype(compute_dtype)
    w3p = _pad2(w3, H2_PAD, H3_PAD).astype(compute_dtype)
    wop = _pad2(params["wo"], H3_PAD, OUT_PAD).astype(compute_dtype)

    b1p = _pad2(b1.reshape(1, -1), 1, H1_PAD).astype(jnp.float32)
    b2p = _pad2(b2.reshape(1, -1), 1, H2_PAD).astype(jnp.float32)
    b3p = _pad2(b3.reshape(1, -1), 1, H3_PAD).astype(jnp.float32)
    bop = _pad2(params["bo"].reshape(1, -1), 1, OUT_PAD).astype(jnp.float32)

    x_pad = jnp.pad(x, ((0, B_pad - B), (0, INPUT_PAD - INPUT_LEN)))
    x_pad = x_pad.astype(compute_dtype)

    full = lambda shape: pl.BlockSpec(shape, lambda i: (0, 0))

    out = pl.pallas_call(
        _mlp_kernel,
        out_shape=jax.ShapeDtypeStruct((B_pad, OUT_PAD), jnp.float32),
        grid_spec=pltpu.PrefetchScalarGridSpec(
            num_scalar_prefetch=0,
            grid=(B_pad // bt,),
            in_specs=[
                pl.BlockSpec((bt, INPUT_PAD), lambda i: (i, 0)),   # x tile (batch-tiled)
                full((INPUT_PAD, H1_PAD)), full((1, H1_PAD)),
                full((H1_PAD, H2_PAD)), full((1, H2_PAD)),
                full((H2_PAD, H3_PAD)), full((1, H3_PAD)),
                full((H3_PAD, OUT_PAD)), full((1, OUT_PAD)),
            ],
            out_specs=pl.BlockSpec((bt, OUT_PAD), lambda i: (i, 0)),
        ),
        compiler_params=pltpu.CompilerParams(
            dimension_semantics=("parallel",)),
    )(x_pad, w1p, b1p, w2p, b2p, w3p, b3p, wop, bop)

    return out[:B, :1]


def init_params(key):
    """Deterministic init mimicking PyTorch defaults (U(-1/sqrt(fan_in), +...))."""
    keys = jax.random.split(key, 8)

    def linear(kw, kb, fan_in, fan_out):
        bound = 1.0 / jnp.sqrt(fan_in)
        w = jax.random.uniform(kw, (fan_in, fan_out), jnp.float32, -bound, bound)
        b = jax.random.uniform(kb, (fan_out,), jnp.float32, -bound, bound)
        return w, b

    w1, b1 = linear(keys[0], keys[1], INPUT_LEN, H1)
    w2, b2 = linear(keys[2], keys[3], H1, H2)
    w3, b3 = linear(keys[4], keys[5], H2, H3)
    wo, bo = linear(keys[6], keys[7], H3, 1)

    def bn(n):
        return (jnp.ones((n,), jnp.float32),   # gamma
                jnp.zeros((n,), jnp.float32),  # beta
                jnp.zeros((n,), jnp.float32),  # running_mean
                jnp.ones((n,), jnp.float32))   # running_var

    return dict(w1=w1, b1=b1, w2=w2, b2=b2, w3=w3, b3=b3, wo=wo, bo=bo,
                bn1=bn(H1), bn2=bn(H2), bn3=bn(H3))


def reference_forward(x, params, compute_dtype=jnp.float32):
    """Pure-JAX reference; compute_dtype emulates the kernel's bf16 operand cast."""
    cdt = compute_dtype
    w1, b1 = _fold_bn(params["w1"], params["b1"], *params["bn1"])
    w2, b2 = _fold_bn(params["w2"], params["b2"], *params["bn2"])
    w3, b3 = _fold_bn(params["w3"], params["b3"], *params["bn3"])

    h = x.astype(cdt)
    h = jnp.dot(h, w1.astype(cdt), preferred_element_type=jnp.float32) + b1
    h = jnp.maximum(h, 0.0).astype(cdt)
    h = jnp.dot(h, w2.astype(cdt), preferred_element_type=jnp.float32) + b2
    h = jnp.maximum(h, 0.0).astype(cdt)
    h = jnp.dot(h, w3.astype(cdt), preferred_element_type=jnp.float32) + b3
    h = jnp.maximum(h, 0.0).astype(cdt)
    y = jnp.dot(h, params["wo"].astype(cdt), preferred_element_type=jnp.float32)
    return y + params["bo"]


if __name__ == "__main__":
    key = jax.random.PRNGKey(0)
    pkey, xkey = jax.random.split(key)
    params = init_params(pkey)

    # Small deterministic test: batch not a multiple of the tile (exercises batch
    # padding) and a small explicit tile so the grid has >1 step.
    batch = 30
    x = jax.random.normal(xkey, (batch, INPUT_LEN), dtype=jnp.float32)

    y = neural_net_forward(x, params, batch_tile=16)
    y = jax.block_until_ready(y)
    assert y.shape == (batch, 1)

    # Bit-level-comparable reference (same bf16 operand quantization, f32 accumulate).
    y_ref_bf16 = reference_forward(x, params, compute_dtype=jnp.bfloat16)
    assert jnp.allclose(y, y_ref_bf16, atol=1e-2, rtol=1e-2), (
        jnp.max(jnp.abs(y - y_ref_bf16)))

    # Loose sanity check against the full-f32 reference.
    y_ref_f32 = reference_forward(x, params, compute_dtype=jnp.float32)
    assert jnp.allclose(y, y_ref_f32, atol=1e-1, rtol=1e-1), (
        jnp.max(jnp.abs(y - y_ref_f32)))

    print("KERNEL_OK")
</pallas_src>

<mosaic_0001>
module attributes {stable_mosaic.version = 11 : i64} {
  func.func @_mlp_kernel(%arg0: i32, %arg1: memref<16x896xbf16, #tpu.memory_space<vmem>>, %arg2: memref<896x256xbf16, #tpu.memory_space<vmem>>, %arg3: memref<1x256xf32, #tpu.memory_space<vmem>>, %arg4: memref<256x128xbf16, #tpu.memory_space<vmem>>, %arg5: memref<1x128xf32, #tpu.memory_space<vmem>>, %arg6: memref<128x128xbf16, #tpu.memory_space<vmem>>, %arg7: memref<1x128xf32, #tpu.memory_space<vmem>>, %arg8: memref<128x128xbf16, #tpu.memory_space<vmem>>, %arg9: memref<1x128xf32, #tpu.memory_space<vmem>>, %arg10: memref<16x128xf32, #tpu.memory_space<vmem>>) attributes {dimension_semantics = [#tpu.dimension_semantics<parallel>], iteration_bounds = array<i64: 2>, scalar_prefetch = 0 : i64, scratch_operands = 0 : i64, tpu.core_type = #tpu.core_type<tc>, window_params = [{transform_indices = @transform_0, window_bounds = array<i64: 16, 896>}, {pipeline_mode = #tpu.pipeline_mode<synchronous>, transform_indices = @transform_1, window_bounds = array<i64: 896, 256>}, {pipeline_mode = #tpu.pipeline_mode<synchronous>, transform_indices = @transform_2, window_bounds = array<i64: 1, 256>}, {pipeline_mode = #tpu.pipeline_mode<synchronous>, transform_indices = @transform_3, window_bounds = array<i64: 256, 128>}, {pipeline_mode = #tpu.pipeline_mode<synchronous>, transform_indices = @transform_4, window_bounds = array<i64: 1, 128>}, {pipeline_mode = #tpu.pipeline_mode<synchronous>, transform_indices = @transform_5, window_bounds = array<i64: 128, 128>}, {pipeline_mode = #tpu.pipeline_mode<synchronous>, transform_indices = @transform_6, window_bounds = array<i64: 1, 128>}, {pipeline_mode = #tpu.pipeline_mode<synchronous>, transform_indices = @transform_7, window_bounds = array<i64: 128, 128>}, {pipeline_mode = #tpu.pipeline_mode<synchronous>, transform_indices = @transform_8, window_bounds = array<i64: 1, 128>}, {transform_indices = @transform_9, window_bounds = array<i64: 16, 128>}]} {
    %c0 = arith.constant 0 : index
    %c0_0 = arith.constant 0 : index
    %0 = vector.load %arg1[%c0, %c0_0] : memref<16x896xbf16, #tpu.memory_space<vmem>>, vector<16x896xbf16>
    %c0_1 = arith.constant 0 : index
    %c0_2 = arith.constant 0 : index
    %1 = vector.load %arg2[%c0_1, %c0_2] : memref<896x256xbf16, #tpu.memory_space<vmem>>, vector<896x256xbf16>
    %cst = arith.constant dense<0.000000e+00> : vector<16x256xf32>
    %2 = tpu.matmul %0, %1, %cst {dimension_numbers = #tpu.dot_dimension_numbers<[1], [0], [0], [1], [0, 0, 1, 1], [], []>} : vector<16x896xbf16>, vector<896x256xbf16>, vector<16x256xf32> -> vector<16x256xf32>
    %c0_3 = arith.constant 0 : index
    %c0_4 = arith.constant 0 : index
    %3 = vector.load %arg3[%c0_3, %c0_4] : memref<1x256xf32, #tpu.memory_space<vmem>>, vector<1x256xf32>
    %4 = vector.broadcast %3 : vector<1x256xf32> to vector<16x256xf32>
    %5 = arith.addf %2, %4 : vector<16x256xf32>
    %cst_5 = arith.constant 0.000000e+00 : f32
    %6 = vector.broadcast %cst_5 : f32 to vector<16x256xf32>
    %7 = arith.maximumf %5, %6 : vector<16x256xf32>
    %8 = arith.truncf %7 : vector<16x256xf32> to vector<16x256xbf16>
    %c0_6 = arith.constant 0 : index
    %c0_7 = arith.constant 0 : index
    %9 = vector.load %arg4[%c0_6, %c0_7] : memref<256x128xbf16, #tpu.memory_space<vmem>>, vector<256x128xbf16>
    %cst_8 = arith.constant dense<0.000000e+00> : vector<16x128xf32>
    %10 = tpu.matmul %8, %9, %cst_8 {dimension_numbers = #tpu.dot_dimension_numbers<[1], [0], [0], [1], [0, 0, 1, 1], [], []>} : vector<16x256xbf16>, vector<256x128xbf16>, vector<16x128xf32> -> vector<16x128xf32>
    %c0_9 = arith.constant 0 : index
    %c0_10 = arith.constant 0 : index
    %11 = vector.load %arg5[%c0_9, %c0_10] : memref<1x128xf32, #tpu.memory_space<vmem>>, vector<1x128xf32>
    %12 = vector.broadcast %11 : vector<1x128xf32> to vector<16x128xf32>
    %13 = arith.addf %10, %12 : vector<16x128xf32>
    %cst_11 = arith.constant 0.000000e+00 : f32
    %14 = vector.broadcast %cst_11 : f32 to vector<16x128xf32>
    %15 = arith.maximumf %13, %14 : vector<16x128xf32>
    %16 = arith.truncf %15 : vector<16x128xf32> to vector<16x128xbf16>
    %c0_12 = arith.constant 0 : index
    %c0_13 = arith.constant 0 : index
    %17 = vector.load %arg6[%c0_12, %c0_13] : memref<128x128xbf16, #tpu.memory_space<vmem>>, vector<128x128xbf16>
    %cst_14 = arith.constant dense<0.000000e+00> : vector<16x128xf32>
    %18 = tpu.matmul %16, %17, %cst_14 {dimension_numbers = #tpu.dot_dimension_numbers<[1], [0], [0], [1], [0, 0, 1, 1], [], []>} : vector<16x128xbf16>, vector<128x128xbf16>, vector<16x128xf32> -> vector<16x128xf32>
    %c0_15 = arith.constant 0 : index
    %c0_16 = arith.constant 0 : index
    %19 = vector.load %arg7[%c0_15, %c0_16] : memref<1x128xf32, #tpu.memory_space<vmem>>, vector<1x128xf32>
    %20 = vector.broadcast %19 : vector<1x128xf32> to vector<16x128xf32>
    %21 = arith.addf %18, %20 : vector<16x128xf32>
    %cst_17 = arith.constant 0.000000e+00 : f32
    %22 = vector.broadcast %cst_17 : f32 to vector<16x128xf32>
    %23 = arith.maximumf %21, %22 : vector<16x128xf32>
    %24 = arith.truncf %23 : vector<16x128xf32> to vector<16x128xbf16>
    %c0_18 = arith.constant 0 : index
    %c0_19 = arith.constant 0 : index
    %25 = vector.load %arg8[%c0_18, %c0_19] : memref<128x128xbf16, #tpu.memory_space<vmem>>, vector<128x128xbf16>
    %cst_20 = arith.constant dense<0.000000e+00> : vector<16x128xf32>
    %26 = tpu.matmul %24, %25, %cst_20 {dimension_numbers = #tpu.dot_dimension_numbers<[1], [0], [0], [1], [0, 0, 1, 1], [], []>} : vector<16x128xbf16>, vector<128x128xbf16>, vector<16x128xf32> -> vector<16x128xf32>
    %c0_21 = arith.constant 0 : index
    %c0_22 = arith.constant 0 : index
    %27 = vector.load %arg9[%c0_21, %c0_22] : memref<1x128xf32, #tpu.memory_space<vmem>>, vector<1x128xf32>
    %28 = vector.broadcast %27 : vector<1x128xf32> to vector<16x128xf32>
    %29 = arith.addf %26, %28 : vector<16x128xf32>
    %c0_23 = arith.constant 0 : index
    %c0_24 = arith.constant 0 : index
    %30 = vector.load %arg10[%c0_23, %c0_24] : memref<16x128xf32, #tpu.memory_space<vmem>>, vector<16x128xf32>
    tpu.vector_store %arg10[%c0_23, %c0_24], %29 {strides = array<i32>} : memref<16x128xf32, #tpu.memory_space<vmem>>, vector<16x128xf32>,
    return
  }
  func.func @transform_0(%arg0: i32) -> (i32, i32) {
    %c0_i32 = arith.constant 0 : i32
    %c0_i32_0 = arith.constant 0 : i32
    return %arg0, %c0_i32 : i32, i32
  }
  func.func @transform_1(%arg0: i32) -> (i32, i32) {
    %c0_i32 = arith.constant 0 : i32
    %c0_i32_0 = arith.constant 0 : i32
    %c0_i32_1 = arith.constant 0 : i32
    return %c0_i32, %c0_i32_0 : i32, i32
  }
  func.func @transform_2(%arg0: i32) -> (i32, i32) {
    %c0_i32 = arith.constant 0 : i32
    %c0_i32_0 = arith.constant 0 : i32
    %c0_i32_1 = arith.constant 0 : i32
    return %c0_i32, %c0_i32_0 : i32, i32
  }
  func.func @transform_3(%arg0: i32) -> (i32, i32) {
    %c0_i32 = arith.constant 0 : i32
    %c0_i32_0 = arith.constant 0 : i32
    %c0_i32_1 = arith.constant 0 : i32
    return %c0_i32, %c0_i32_0 : i32, i32
  }
  func.func @transform_4(%arg0: i32) -> (i32, i32) {
    %c0_i32 = arith.constant 0 : i32
    %c0_i32_0 = arith.constant 0 : i32
    %c0_i32_1 = arith.constant 0 : i32
    return %c0_i32, %c0_i32_0 : i32, i32
  }
  func.func @transform_5(%arg0: i32) -> (i32, i32) {
    %c0_i32 = arith.constant 0 : i32
    %c0_i32_0 = arith.constant 0 : i32
    %c0_i32_1 = arith.constant 0 : i32
    return %c0_i32, %c0_i32_0 : i32, i32
  }
  func.func @transform_6(%arg0: i32) -> (i32, i32) {
    %c0_i32 = arith.constant 0 : i32
    %c0_i32_0 = arith.constant 0 : i32
    %c0_i32_1 = arith.constant 0 : i32
    return %c0_i32, %c0_i32_0 : i32, i32
  }
  func.func @transform_7(%arg0: i32) -> (i32, i32) {
    %c0_i32 = arith.constant 0 : i32
    %c0_i32_0 = arith.constant 0 : i32
    %c0_i32_1 = arith.constant 0 : i32
    return %c0_i32, %c0_i32_0 : i32, i32
  }
  func.func @transform_8(%arg0: i32) -> (i32, i32) {
    %c0_i32 = arith.constant 0 : i32
    %c0_i32_0 = arith.constant 0 : i32
    %c0_i32_1 = arith.constant 0 : i32
    return %c0_i32, %c0_i32_0 : i32, i32
  }
  func.func @transform_9(%arg0: i32) -> (i32, i32) {
    %c0_i32 = arith.constant 0 : i32
    %c0_i32_0 = arith.constant 0 : i32
    return %arg0, %c0_i32 : i32, i32
  }
}

</mosaic_0001>

<bundles_post_ra>
// kernel: tpu_custom_call.1
= control target key start
LH: loop header
LB: loop body
LE: loop exit
PB: predicated region body
PF: predicated region fallthrough
CT: control target
= control target key end

     0   :  { %s3267_s0 = inlined_call_operand.hbm [shape: bf16[32,896], index: 0, kind: input, shape index: {}]   ;;  %s3268_s1 = inlined_call_operand.hbm [shape: bf16[896,256], index: 1, kind: input, shape index: {}]   ;;  %s3269_s2 = inlined_call_operand.hbm [shape: f32[1,256], index: 2, kind: input, shape index: {}]   ;;  %s3270_s3 = inlined_call_operand.hbm [shape: bf16[256,128], index: 3, kind: input, shape index: {}]   ;;  %s3271_s4 = inlined_call_operand.vmem [shape: f32[1,128], index: 4, kind: input, shape index: {}]   ;;  %s3272_s5 = inlined_call_operand.hbm [shape: bf16[128,128], index: 5, kind: input, shape index: {}]   ;;  %s3273_s6 = inlined_call_operand.vmem [shape: f32[1,128], index: 6, kind: input, shape index: {}]   ;;  %s3274_s7 = inlined_call_operand.hbm [shape: bf16[128,128], index: 7, kind: input, shape index: {}]   ;;  %s3275_s8 = inlined_call_operand.vmem [shape: f32[1,128], index: 8, kind: input, shape index: {}]   ;;  %s3276_s9 = inlined_call_operand.hbm [shape: f32[32,128], index: 9, kind: output, shape index: {}]  }
   0x1   :  { %3277 = sst [smem:[#allocation20_spill]] %s3268_s1 }
   0x2   :  { %3278 = sst [smem:[#allocation21_spill]] %s3269_s2 }
   0x3   :  { %3279 = sst [smem:[#allocation22_spill]] %s3270_s3 }
   0x4   :  { %3280 = sst [smem:[#allocation23_spill]] %s3272_s5 }
   0x5   :  { %3281 = sst [smem:[#allocation24_spill]] %s3274_s7 }
   0x6   :  { %14 = vsyncpa [#allocation3], 0 }
   0x7   :  { %16 = vsyncpa [#allocation3 + $0x1], 0 }
   0x8   :  { %17 = vsyncpa [#allocation6], 0 }
   0x9   :  { %18 = vsyncpa [#allocation9], 0 }
   0xa   :  { %19 = vsyncpa [#allocation12], 0 }
   0xb   :  { %20 = vsyncpa [#allocation4], 0 }
   0xc   :  { %22 = vsyncpa [#allocation4 + $0x1], 0  ;;  %s3043_s30 = smov 0   ;;  %s3045_s10 = smov 0  }
   0xd   :  { %s3047_s11 = smov 0   ;;  %s3049_s12 = smov 0  }
   0xe LB: > { %s3282_s1 = sld [smem:[#allocation20_spill]]  ;;  %s3067_s16 = sadd.s32 4294967295, %s2978_s12   ;;  %s2978_s12 = sphi %s3049_s12, %s3299_s12   ;;  %s2974_s11 = sphi %s3047_s11, %s3298_s11   ;;  %s2970_s10 = sphi %s3045_s10, %s3297_s10   ;;  %s2966_s30 = sphi %s3043_s30, %s3296_s30  }
   0xf   : > { %p1831_p0 = scmp.ge.s32.totalorder %s2978_s12, 1  ;;  %p49_p1 = scmp.eq.s32.totalorder %s3067_s16, 0 }
  0x10   : > { %p253_p2 = scmp.lt.s32.totalorder %s2978_s12, 3  ;;  %s2980_s18 = smov [#allocation5]  }
  0x11   : > { %s266_s19 = sshll.u32 %s2980_s18, 4  ;;  %s3284_s3 = sld [smem:[#allocation22_spill]]  ;;  %s267_s19 = int_to_ptr.vmem [resolvable:$true] %s266_s19 }
  0x12   : > { %p3072_p3 = pnand %p1831_p0, %p253_p2  ;;  %s2981_s24 = smov [#allocation8]  }
  0x13   : > { %s292_s25 = sshll.u32 %s2981_s24, 4  ;;  %s2982_s26 = smov 128   ;;  %s293_s25 = int_to_ptr.vmem [resolvable:$true] %s292_s25 }
  0x14   : > { %s264_s15 = sshll.u32 %s3282_s1, 4  ;;  %p2636_p4 = pneg %p3072_p3  ;;  %s265_s15 = int_to_ptr.hbm [resolvable:$true] %s264_s15 }
  0x15   : > { %s2983_s27 = smov 8   ;;  %s2984_s28 = smov 64  }
  0x16   : > { %p3084_p6 = pnand %p2636_p4, %p49_p1  ;;  %s2985_s29 = smov 4  }
  0x17   : > { %s290_s22 = sshll.u32 %s3284_s3, 4  ;;  %s3286_s2 = sld [smem:[#allocation21_spill]]  ;;  %s291_s22 = int_to_ptr.hbm [resolvable:$true] %s290_s22 }
  0x18   : > { %2639 = dma.hbm_to_vmem [thread:$0]  (!%p3084_p6), %s265_s15, 14336, %s267_s19, [#allocation6], %s2982_s26, %s2982_s26, %s2983_s27  }
  0x19   : > { %2645 = dma.hbm_to_vmem [thread:$0]  (!%p3084_p6), %s291_s22, 2048, %s293_s25, [#allocation9], %s2984_s28, %s2984_s28, %s2985_s29  }
  0x1a   : > { %s2986_s20 = smov [#allocation7]   ;;  %s3287_s5 = sld [smem:[#allocation23_spill]] }
  0x1b   : > { %s281_s21 = sshll.u32 %s2986_s20, 4  ;;  %s2987_s19 = smov [#allocation10]   ;;  %s282_s21 = int_to_ptr.vmem [resolvable:$true] %s281_s21 }
  0x1c   : > { %s309_s22 = sshll.u32 %s2987_s19, 4  ;;  %s3288_s7 = sld [smem:[#allocation24_spill]]  ;;  %s310_s22 = int_to_ptr.vmem [resolvable:$true] %s309_s22 }
  0x1d   : > { %s279_s18 = sshll.u32 %s3286_s2, 4  ;;  %s2988_s1 = smov [#allocation11]   ;;  %s280_s18 = int_to_ptr.hbm [resolvable:$true] %s279_s18 }
  0x1e   : > { %2642 = dma.hbm_to_vmem [thread:$0]  (!%p3084_p6), %s280_s18, 32, %s282_s21, [#allocation6]  }
  0x1f   : > { %s326_s13 = sshll.u32 %s2988_s1, 4  ;;  %s1830_s14 = sadd.s32 4294967294, %s2978_s12   ;;  %s327_s13 = int_to_ptr.vmem [resolvable:$true] %s326_s13 }
  0x20   : > { %s307_s15 = sshll.u32 %s3287_s5, 4  ;;  %s3109_s18 = sadd.s32 1, %s2978_s12   ;;  %s308_s15 = int_to_ptr.hbm [resolvable:$true] %s307_s15 }
  0x21   : > { %2648 = dma.hbm_to_vmem [thread:$0]  (!%p3084_p6), %s308_s15, 1024, %s310_s22, [#allocation9], %s2984_s28, %s2984_s28, %s2985_s29  }
  0x22   : > { %s324_s27 = sshll.u32 %s3288_s7, 4  ;;  %s35_s20 = sadd.s32 1, %s2974_s11  ;;  %s325_s27 = int_to_ptr.hbm [resolvable:$true] %s324_s27 }
  0x23   : > { %2651 = dma.hbm_to_vmem [thread:$0]  (!%p3084_p6), %s325_s27, 1024, %s327_s13, [#allocation12], %s2984_s28, %s2984_s28, %s2985_s29  }
  0x24   : > { %s32_s21 = ssub.s32 %s2978_s12, %s3109_s18  ;;  %p42_p7 = scmp.ne.s32.totalorder %s2974_s11, %s2970_s10 }
  0x25   : > { %p33_p8 = scmp.eq.s32.totalorder %s32_s21, 0  ;;  %p43_p9 = scmp.eq.s32.totalorder %s2978_s12, 0 }
  0x26   : > { %p48_p10 = scmp.ne.s32.totalorder %s2970_s10, %s2966_s30  ;;  %p240_p11 = scmp.eq.s32.totalorder %s3067_s16, 1 }
  0x27   : > { %s3121_s24 = scalar_select %p33_p8, %s2974_s11, %s35_s20  }
  0x28   : > { %p44_p12 = por %p43_p9, %p42_p7  ;;  %p3125_p13 = por %p49_p1, %p48_p10 }
  0x29   : > { %3289 = sst [smem:[#allocation19_spill]] %s3121_s24  ;;  %p3129_p0 = por %p240_p11, %p42_p7 }
  0x2a   : > { %p246_p2 = scmp.eq.s32.totalorder %s1830_s14, 1  ;;  %p2665_p4 = scmp.lt.s32.totalorder %s2978_s12, 2 }
  0x2b   : > { %s343_s29 = sand.u32 1, %s2974_s11   ;;  %s2610_s25 = smul.u32 56, %s2978_s12 }
  0x2c   : > { %p3135_p6 = por %p246_p2, %p48_p10  ;;  %s2609_s19 = smul.u32 56, %s343_s29 }
  0x2d   : > { %p3139_p8 = pnand %p2665_p4, %p44_p12  ;;  %s353_s1 = scalar_lea.hbm %s3267_s0, %s2610_s25 }
  0x2e   : > { %s347_s13 = scalar_lea.vmem [#allocation2], %s2609_s19  ;;  %s354_s14 = sshll.u32 %s353_s1, 4  ;;  %s355_s14 = int_to_ptr.hbm [resolvable:$true] %s354_s14 }
  0x2f   : > { %s356_s20 = sshll.u32 %s347_s13, 4  ;;  %s344_s21 = scalar_lea.sflag [#allocation3], %s343_s29  ;;  %s357_s20 = int_to_ptr.vmem [resolvable:$true] %s356_s20 }
  0x30   : > { %s2870_s2 = sshra.s32 %s355_s14, 4  ;;  %p2874_p9 = pneg %p3139_p8  ;;  %s2871_s2 = int_to_ptr.hbm [resolvable:$true] %s2870_s2 }
  0x31   : > { %s2872_s3 = scalar_lea.hbm %s2871_s2, 56  ;;  %s2877_s24 = scalar_lea.hbm %s3267_s0, 112 }
  0x32   : > { %p2873_p7 = scmp.ne.s32.totalorder %s2871_s2, %s2872_s3  ;;  %p2878_p12 = scmp.lt.s32.totalorder %s2871_s2, %s3267_s0 }
  0x33   : > { %p2879_p2 = scmp.lt.s32.totalorder %s2877_s24, %s2872_s3 }
  0x34   : > { %p2875_p10 = pnand %p2874_p9, %p2873_p7 }
  0x35   : > { %p2880_p4 = por %p2879_p2, %p2878_p12 }
  0x36   : > { %p2876_p11 = pneg %p2875_p10 }
  0x38   : > { %p2881_p5 = pnand %p2880_p4, %p2876_p11 }
  0x3a   : > { %2884 = shalt.err (!%p2881_p5)
}
  0x3b   : > { %s2989_s29 = smov 448   ;;  %s2990_s19 = smov 28  }
  0x3c   : > { %2655 = dma.hbm_to_vmem [thread:$0]  (!%p3139_p8), %s355_s14, 896, %s357_s20, %s344_s21, %s2989_s29, %s2989_s29, %s2990_s19  }
  0x3d   : > { %368 = sbr.rel (%p3072_p3) target bundleno = 771 (0x303), region = 56  ;;  %s3160_s5 = sand.u32 (!%p3072_p3), 1, %s2970_s10  }
  0x3e   : > { %s2611_s7 = smul.u32 (!%p3072_p3), 56, %s3160_s5  ;;  %s371_s2 = scalar_lea.sflag (!%p3072_p3), [#allocation3], %s3160_s5 }
  0x40   : > { %s3164_s3 = scalar_lea.vmem (!%p3072_p3), [#allocation2], %s2611_s7 }
  0x42   : > { %2945 = dma.done.wait (%p3125_p13), %s371_s2, 896  }
  0x43   : > { %2947 = vsyncadd (%p3125_p13), %s371_s2, 4294966400 }
  0x44   : > { %2949 = dma.done.wait (%p49_p1), [#allocation6], 14368  }
  0x45   : > { %2951 = vsyncadd (%p49_p1), [#allocation6], 4294952928 }
  0x46   : > { %2953 = dma.done.wait (%p49_p1), [#allocation9], 3072  }
  0x47   : > { %2955 = vsyncadd (%p49_p1), [#allocation9], 4294964224 }
  0x48   : > { %2957 = dma.done.wait (%p49_p1), [#allocation12], 1024  }
  0x49   : > { %2959 = vsyncadd (%p49_p1), [#allocation12], 4294966272  ;;  %v1934_v0 = vld [vmem:[#allocation5 + $0x70] sm:$0xf]  ;;  %v2479_v1 = vld [vmem:[#allocation5 + $0x74] sm:$0xf0] }
  0x4a   : > { %v1998_v2 = vld [vmem:[#allocation5 + $0xf0] sm:$0xf]  ;;  %v1935_v3 = vor.u32 %v2479_v1, %v1934_v0  ;;  %v2495_v4 = vld [vmem:[#allocation5 + $0xf4] sm:$0xf0]  ;;  %v1926_v9 = vld [vmem:[#allocation5 + $0x60] sm:$0xf] }
  0x4b   : > { %v2062_v5 = vld [vmem:[#allocation5 + $0x170] sm:$0xf]  ;;  %v2511_v6 = vld [vmem:[#allocation5 + $0x174] sm:$0xf0]  ;;  %v1999_v7 = vor.u32 %v2495_v4, %v1998_v2  ;;  %v2477_v10 = vld [vmem:[#allocation5 + $0x64] sm:$0xf0] }
  0x4c   : > { %v2063_v8 = vor.u32 %v2511_v6, %v2062_v5  ;;  %v1990_v11 = vld [vmem:[#allocation5 + $0xe0] sm:$0xf]  ;;  %1159 = vmatpush.bf16.msra.mxu0 %v1935_v3  ;;  %v1927_v12 = vor.u32 %v2477_v10, %v1926_v9  ;;  %v2493_v13 = vld [vmem:[#allocation5 + $0xe4] sm:$0xf0]  ;;  %v2126_v18 = vld [vmem:[#allocation5 + $0x1f0] sm:$0xf] }
  0x4d   : > { %v2054_v14 = vld [vmem:[#allocation5 + $0x160] sm:$0xf]  ;;  %v2509_v15 = vld [vmem:[#allocation5 + $0x164] sm:$0xf0]  ;;  %1173 = vmatpush.bf16.msra.mxu1 %v1999_v7  ;;  %v1991_v16 = vor.u32 %v2493_v13, %v1990_v11  ;;  %v2527_v19 = vld [vmem:[#allocation5 + $0x1f4] sm:$0xf0] }
  0x4e   : > { %1187 = vmatpush.bf16.msra.mxu2 %v2063_v8  ;;  %v2055_v17 = vor.u32 %v2509_v15, %v2054_v14  ;;  %v1918_v20 = vld [vmem:[#allocation5 + $0x50] sm:$0xf]  ;;  %v2127_v21 = vor.u32 %v2527_v19, %v2126_v18  ;;  %v2475_v22 = vld [vmem:[#allocation5 + $0x54] sm:$0xf0]  ;;  %v2118_v27 = vld [vmem:[#allocation5 + $0x1e0] sm:$0xf] }
  0x4f   : > { %v1982_v23 = vld [vmem:[#allocation5 + $0xd0] sm:$0xf]  ;;  %v2491_v24 = vld [vmem:[#allocation5 + $0xd4] sm:$0xf0]  ;;  %v1919_v28 = vor.u32 %v2475_v22, %v1918_v20  ;;  %v2525_v29 = vld [vmem:[#allocation5 + $0x1e4] sm:$0xf0] }
  0x50   : > { %v2046_v25 = vld [vmem:[#allocation5 + $0x150] sm:$0xf]  ;;  %v2507_v26 = vld [vmem:[#allocation5 + $0x154] sm:$0xf0]  ;;  %1160 = vmatpush.bf16.msra.mxu0 %v1927_v12  ;;  %1201 = vmatpush.bf16.msra.mxu3 %v2127_v21  ;;  %v1910_v30 = vld [vmem:[#allocation5 + $0x40] sm:$0xf]  ;;  %v1983_v32 = vor.u32 %v2491_v24, %v1982_v23  ;;  %v2119_v34 = vor.u32 %v2525_v29, %v2118_v27 }
  0x51   : > { %v2473_v31 = vld [vmem:[#allocation5 + $0x44] sm:$0xf0]  ;;  %1174 = vmatpush.bf16.msra.mxu1 %v1991_v16  ;;  %v2047_v33 = vor.u32 %v2507_v26, %v2046_v25  ;;  %v1974_v35 = vld [vmem:[#allocation5 + $0xc0] sm:$0xf]  ;;  %v2110_v39 = vld [vmem:[#allocation5 + $0x1d0] sm:$0xf] }
  0x52   : > { %1188 = vmatpush.bf16.msra.mxu2 %v2055_v17  ;;  %v2489_v36 = vld [vmem:[#allocation5 + $0xc4] sm:$0xf0]  ;;  %v2038_v37 = vld [vmem:[#allocation5 + $0x140] sm:$0xf]  ;;  %v2523_v40 = vld [vmem:[#allocation5 + $0x1d4] sm:$0xf0]  ;;  %v1911_v41 = vor.u32 %v2473_v31, %v1910_v30 }
  0x53   : > { %v2505_v38 = vld [vmem:[#allocation5 + $0x144] sm:$0xf0]  ;;  %v2111_v42 = vor.u32 %v2523_v40, %v2110_v39  ;;  %v1902_v43 = vld [vmem:[#allocation5 + $0x30] sm:$0xf]  ;;  %v2471_v44 = vld [vmem:[#allocation5 + $0x34] sm:$0xf0]  ;;  %v1975_v45 = vor.u32 %v2489_v36, %v1974_v35 }
  0x54   : > { %1161 = vmatpush.bf16.msra.mxu0 %v1919_v28  ;;  %1202 = vmatpush.bf16.msra.mxu3 %v2119_v34  ;;  %v2039_v46 = vor.u32 %v2505_v38, %v2038_v37  ;;  %v1966_v47 = vld [vmem:[#allocation5 + $0xb0] sm:$0xf]  ;;  %v2102_v48 = vld [vmem:[#allocation5 + $0x1c0] sm:$0xf]  ;;  %v2521_v49 = vld [vmem:[#allocation5 + $0x1c4] sm:$0xf0]  ;;  %v1903_v53 = vor.u32 %v2471_v44, %v1902_v43 }
  0x55   : > { %1175 = vmatpush.bf16.msra.mxu1 %v1983_v32  ;;  %v2487_v50 = vld [vmem:[#allocation5 + $0xb4] sm:$0xf0]  ;;  %v2030_v51 = vld [vmem:[#allocation5 + $0x130] sm:$0xf]  ;;  %v2103_v54 = vor.u32 %v2521_v49, %v2102_v48  ;;  %v1894_v55 = vld [vmem:[#allocation5 + $0x20] sm:$0xf] }
  0x56   : > { %1189 = vmatpush.bf16.msra.mxu2 %v2047_v33  ;;  %v2503_v52 = vld [vmem:[#allocation5 + $0x134] sm:$0xf0]  ;;  %v2469_v56 = vld [vmem:[#allocation5 + $0x24] sm:$0xf0]  ;;  %v1967_v57 = vor.u32 %v2487_v50, %v1966_v47  ;;  %v1958_v59 = vld [vmem:[#allocation5 + $0xa0] sm:$0xf] }
  0x57   : > { %v2031_v58 = vor.u32 %v2503_v52, %v2030_v51  ;;  %v2094_v60 = vld [vmem:[#allocation5 + $0x1b0] sm:$0xf]  ;;  %v2519_v61 = vld [vmem:[#allocation5 + $0x1b4] sm:$0xf0]  ;;  %v2485_v62 = vld [vmem:[#allocation5 + $0xa4] sm:$0xf0]  ;;  %v1895_v1 = vor.u32 %v2469_v56, %v1894_v55 }
  0x58   : > { %1162 = vmatpush.bf16.msra.mxu0 %v1911_v41  ;;  %1203 = vmatpush.bf16.msra.mxu3 %v2111_v42  ;;  %v2022_v63 = vld [vmem:[#allocation5 + $0x120] sm:$0xf]  ;;  %v2501_v0 = vld [vmem:[#allocation5 + $0x124] sm:$0xf0]  ;;  %v2095_v2 = vor.u32 %v2519_v61, %v2094_v60  ;;  %v1886_v3 = vld [vmem:[#allocation5 + $0x10] sm:$0xf]  ;;  %v1959_v5 = vor.u32 %v2485_v62, %v1958_v59 }
  0x59   : > { %1176 = vmatpush.bf16.msra.mxu1 %v1975_v45  ;;  %v2467_v4 = vld [vmem:[#allocation5 + $0x14] sm:$0xf0]  ;;  %v2023_v6 = vor.u32 %v2501_v0, %v2022_v63  ;;  %v1950_v7 = vld [vmem:[#allocation5 + $0x90] sm:$0xf]  ;;  %v2086_v8 = vld [vmem:[#allocation5 + $0x1a0] sm:$0xf] }
  0x5a   : > { %1190 = vmatpush.bf16.msra.mxu2 %v2039_v46  ;;  %v2517_v9 = vld [vmem:[#allocation5 + $0x1a4] sm:$0xf0]  ;;  %v2483_v10 = vld [vmem:[#allocation5 + $0x94] sm:$0xf0]  ;;  %v2014_v11 = vld [vmem:[#allocation5 + $0x110] sm:$0xf]  ;;  %v1887_v13 = vor.u32 %v2467_v4, %v1886_v3 }
  0x5b   : > { %v2499_v12 = vld [vmem:[#allocation5 + $0x114] sm:$0xf0]  ;;  %v2087_v14 = vor.u32 %v2517_v9, %v2086_v8  ;;  %v1878_v15 = vld [vmem:[#allocation5] sm:$0xf]  ;;  %v2465_v16 = vld [vmem:[#allocation5 + $0x4] sm:$0xf0]  ;;  %v1951_v18 = vor.u32 %v2483_v10, %v1950_v7 }
  0x5c   : > { %1163 = vmatpush.bf16.msra.mxu0 %v1903_v53  ;;  %1204 = vmatpush.bf16.msra.mxu3 %v2103_v54  ;;  %v1942_v17 = vld [vmem:[#allocation5 + $0x80] sm:$0xf]  ;;  %v2015_v19 = vor.u32 %v2499_v12, %v2014_v11  ;;  %v2481_v20 = vld [vmem:[#allocation5 + $0x84] sm:$0xf0]  ;;  %v2078_v21 = vld [vmem:[#allocation5 + $0x190] sm:$0xf]  ;;  %v1879_v29 = vor.u32 %v2465_v16, %v1878_v15 }
  0x5d   : > { %1177 = vmatpush.bf16.msra.mxu1 %v1967_v57  ;;  %v2515_v22 = vld [vmem:[#allocation5 + $0x194] sm:$0xf0]  ;;  %v2006_v23 = vld [vmem:[#allocation5 + $0x100] sm:$0xf]  ;;  %v2497_v24 = vld [vmem:[#allocation5 + $0x104] sm:$0xf0]  ;;  %v1943_v33 = vor.u32 %v2481_v20, %v1942_v17 }
  0x5e   : > { %1191 = vmatpush.bf16.msra.mxu2 %v2031_v58  ;;  %v2190_v25 = vld [vmem:[#allocation5 + $0x270] sm:$0xf]  ;;  %v2543_v26 = vld [vmem:[#allocation5 + $0x274] sm:$0xf0]  ;;  %v2079_v30 = vor.u32 %v2515_v22, %v2078_v21  ;;  %v2007_v34 = vor.u32 %v2497_v24, %v2006_v23  ;;  %v2070_v35 = vld [vmem:[#allocation5 + $0x180] sm:$0xf] }
  0x5f   : > { %v2254_v27 = vld [vmem:[#allocation5 + $0x2f0] sm:$0xf]  ;;  %v2559_v28 = vld [vmem:[#allocation5 + $0x2f4] sm:$0xf0]  ;;  %v2513_v36 = vld [vmem:[#allocation5 + $0x184] sm:$0xf0]  ;;  %v2191_v38 = vor.u32 %v2543_v26, %v2190_v25 }
  0x60   : > { %1164 = vmatpush.bf16.msra.mxu0 %v1895_v1  ;;  %1205 = vmatpush.bf16.msra.mxu3 %v2095_v2  ;;  %v2318_v31 = vld [vmem:[#allocation5 + $0x370] sm:$0xf]  ;;  %v2575_v32 = vld [vmem:[#allocation5 + $0x374] sm:$0xf0]  ;;  %v2182_v37 = vld [vmem:[#allocation5 + $0x260] sm:$0xf]  ;;  %v2255_v39 = vor.u32 %v2559_v28, %v2254_v27  ;;  %v2071_v47 = vor.u32 %v2513_v36, %v2070_v35 }
  0x61   : > { %1178 = vmatpush.bf16.msra.mxu1 %v1959_v5  ;;  %v2541_v40 = vld [vmem:[#allocation5 + $0x264] sm:$0xf0]  ;;  %v2478_v41 = vld [vmem:[#allocation5 + $0x74] sm:$0xf]  ;;  %v1936_v42 = vld [vmem:[#allocation5 + $0x78] sm:$0xf0]  ;;  %v2319_v43 = vor.u32 %v2575_v32, %v2318_v31 }
  0x62   : > { %1192 = vmatpush.bf16.msra.mxu2 %v2023_v6  ;;  %v2246_v44 = vld [vmem:[#allocation5 + $0x2e0] sm:$0xf]  ;;  %v2557_v45 = vld [vmem:[#allocation5 + $0x2e4] sm:$0xf0]  ;;  %v2460_v50 = vld [vmem:[%s3164_s3 + $0x18] sm:$0xf0]  ;;  %v1939_v51 = vor.u32 %v2478_v41, %v1936_v42  ;;  %v2183_v56 = vor.u32 %v2541_v40, %v2182_v37 }
  0x63   : > { %v2310_v46 = vld [vmem:[#allocation5 + $0x360] sm:$0xf]  ;;  %v2573_v48 = vld [vmem:[#allocation5 + $0x364] sm:$0xf0]  ;;  %v2174_v52 = vld [vmem:[#allocation5 + $0x250] sm:$0xf]  ;;  %v2247_v57 = vor.u32 %v2557_v45, %v2246_v44 }
  0x64   : > { %1165 = vmatpush.bf16.msra.mxu0 %v1887_v13  ;;  %1206 = vmatpush.bf16.msra.mxu3 %v2087_v14  ;;  %v1850_v49 = vld [vmem:[%s3164_s3] sm:$0xf]  ;;  %v1858_v54 = vld [vmem:[%s3164_s3 + $0x8] sm:$0xf]  ;;  %v2461_v55 = vld [vmem:[%s3164_s3 + $0x20] sm:$0xf0]  ;;  %v2311_v62 = vor.u32 %v2573_v48, %v2310_v46 }
  0x65   : > { %1179 = vmatpush.bf16.msra.mxu1 %v1951_v18  ;;  %v3184_v53 = vor.u32 %v2460_v50, %v1850_v49  ;;  %v2539_v58 = vld [vmem:[#allocation5 + $0x254] sm:$0xf0]  ;;  %v2476_v59 = vld [vmem:[#allocation5 + $0x64] sm:$0xf]  ;;  %v1928_v60 = vld [vmem:[#allocation5 + $0x68] sm:$0xf0]  ;;  %v3188_v61 = vor.u32 %v2461_v55, %v1858_v54 }
  0x66   : > { %1193 = vmatpush.bf16.msra.mxu2 %v2015_v19  ;;  %v2238_v63 = vld [vmem:[#allocation5 + $0x2d0] sm:$0xf]  ;;  %v2555_v0 = vld [vmem:[#allocation5 + $0x2d4] sm:$0xf0]  ;;  %v2457_v1 = vld [vmem:[%s3164_s3 + $0x4] sm:$0xf]  ;;  %v1931_v5 = vor.u32 %v2476_v59, %v1928_v60  ;;  %v2175_v9 = vor.u32 %v2539_v58, %v2174_v52 }
  0x67   : > { %v2302_v2 = vld [vmem:[#allocation5 + $0x350] sm:$0xf]  ;;  %v2571_v3 = vld [vmem:[#allocation5 + $0x354] sm:$0xf0]  ;;  %v2166_v6 = vld [vmem:[#allocation5 + $0x240] sm:$0xf]  ;;  %v2239_v10 = vor.u32 %v2555_v0, %v2238_v63 }
  0x68   : > { %1166 = vmatpush.bf16.msra.mxu0 %v1879_v29  ;;  %1207 = vmatpush.bf16.msra.mxu3 %v2079_v30  ;;  %v1852_v4 = vld [vmem:[%s3164_s3 + $0x1c] sm:$0xf0]  ;;  %v2230_v11 = vld [vmem:[#allocation5 + $0x2c0] sm:$0xf]  ;;  %v2474_v12 = vld [vmem:[#allocation5 + $0x54] sm:$0xf]  ;;  %v2303_v14 = vor.u32 %v2571_v3, %v2302_v2 }
  0x69   : > { %1180 = vmatpush.bf16.msra.mxu1 %v1943_v33  ;;  %v2537_v7 = vld [vmem:[#allocation5 + $0x244] sm:$0xf0]  ;;  %v3194_v8 = vor.u32 %v2457_v1, %v1852_v4  ;;  %v1920_v13 = vld [vmem:[#allocation5 + $0x58] sm:$0xf0]  ;;  %v1860_v17 = vld [vmem:[%s3164_s3 + $0x24] sm:$0xf0] }
  0x6a   : > { %1194 = vmatpush.bf16.msra.mxu2 %v2007_v34  ;;  %v2553_v15 = vld [vmem:[#allocation5 + $0x2c4] sm:$0xf0]  ;;  %v2458_v16 = vld [vmem:[%s3164_s3 + $0xc] sm:$0xf]  ;;  %v2294_v18 = vld [vmem:[#allocation5 + $0x340] sm:$0xf]  ;;  %v1923_v21 = vor.u32 %v2474_v12, %v1920_v13  ;;  %v2167_v22 = vor.u32 %v2537_v7, %v2166_v6 }
  0x6b   : > { %1167 = vmatmul.bf16.vlgmr.msra.gmra.mxu0 %v3184_v53  ;;  %v2569_v19 = vld [vmem:[#allocation5 + $0x344] sm:$0xf0]  ;;  %v3199_v20 = vor.u32 %v2458_v16, %v1860_v17  ;;  %v2231_v23 = vor.u32 %v2553_v15, %v2230_v11  ;;  %v2158_v24 = vld [vmem:[#allocation5 + $0x230] sm:$0xf]  ;;  %v2472_v25 = vld [vmem:[#allocation5 + $0x44] sm:$0xf] }
  0x6c   : > { %1215 = vmatpush.bf16.msrb.mxu0 %v2191_v38  ;;  %1208 = vmatpush.bf16.msra.mxu3 %v2071_v47  ;;  %v1912_v26 = vld [vmem:[#allocation5 + $0x48] sm:$0xf0]  ;;  %v2295_v27 = vor.u32 %v2569_v19, %v2294_v18  ;;  %v2535_v28 = vld [vmem:[#allocation5 + $0x234] sm:$0xf0]  ;;  %v2222_v29 = vld [vmem:[#allocation5 + $0x2b0] sm:$0xf] }
  0x6d   : > { %1229 = vmatpush.bf16.msrb.mxu1 %v2255_v39  ;;  %1195 = vmatmul.bf16.vlgmr.msra.gmra.mxu2 %v3188_v61  ;;  %v2551_v30 = vld [vmem:[#allocation5 + $0x2b4] sm:$0xf0]  ;;  %v2286_v31 = vld [vmem:[#allocation5 + $0x330] sm:$0xf]  ;;  %v1915_v33 = vor.u32 %v2472_v25, %v1912_v26  ;;  %v2159_v34 = vor.u32 %v2535_v28, %v2158_v24  ;;  %v2150_v36 = vld [vmem:[#allocation5 + $0x220] sm:$0xf] }
  0x6e   : > { %1243 = vmatpush.bf16.msrb.mxu2 %v2319_v43  ;;  %1181 = vmatmul.bf16.vlgmr.msra.gmra.mxu1 %v3194_v8  ;;  %v2567_v32 = vld [vmem:[#allocation5 + $0x334] sm:$0xf0]  ;;  %v2223_v35 = vor.u32 %v2551_v30, %v2222_v29  ;;  %v2470_v37 = vld [vmem:[#allocation5 + $0x34] sm:$0xf]  ;;  %v1904_v38 = vld [vmem:[#allocation5 + $0x38] sm:$0xf0] }
  0x6f   : > { %1209 = vmatmul.bf16.vlgmr.msra.gmra.mxu3 %v3199_v20  ;;  %v2287_v39 = vor.u32 %v2567_v32, %v2286_v31  ;;  %v2533_v40 = vld [vmem:[#allocation5 + $0x224] sm:$0xf0]  ;;  %v2214_v41 = vld [vmem:[#allocation5 + $0x2a0] sm:$0xf]  ;;  %v1907_v45 = vor.u32 %v2470_v37, %v1904_v38  ;;  %v2142_v48 = vld [vmem:[#allocation5 + $0x210] sm:$0xf] }
  0x70   : > { %1257 = vmatpush.bf16.msrb.mxu3 %v1939_v51  ;;  %1216 = vmatpush.bf16.msrb.mxu0 %v2183_v56  ;;  %v2549_v42 = vld [vmem:[#allocation5 + $0x2a4] sm:$0xf0]  ;;  %v2278_v43 = vld [vmem:[#allocation5 + $0x320] sm:$0xf]  ;;  %v2151_v46 = vor.u32 %v2533_v40, %v2150_v36  ;;  %v2468_v49 = vld [vmem:[#allocation5 + $0x24] sm:$0xf] }
  0x71   : > { %1230 = vmatpush.bf16.msrb.mxu1 %v2247_v57  ;;  %v2565_v44 = vld [vmem:[#allocation5 + $0x324] sm:$0xf0]  ;;  %v2215_v47 = vor.u32 %v2549_v42, %v2214_v41  ;;  %v1896_v50 = vld [vmem:[#allocation5 + $0x28] sm:$0xf0]  ;;  %v2531_v52 = vld [vmem:[#allocation5 + $0x214] sm:$0xf0] }
  0x72   : > { %1244 = vmatpush.bf16.msrb.mxu2 %v2311_v62  ;;  %v2279_v51 = vor.u32 %v2565_v44, %v2278_v43  ;;  %v2206_v54 = vld [vmem:[#allocation5 + $0x290] sm:$0xf]  ;;  %v2547_v55 = vld [vmem:[#allocation5 + $0x294] sm:$0xf0]  ;;  %v1899_v58 = vor.u32 %v2468_v49, %v1896_v50  ;;  %v2134_v59 = vld [vmem:[#allocation5 + $0x200] sm:$0xf]  ;;  %v2143_v0 = vor.u32 %v2531_v52, %v2142_v48 }
  0x73   : > { %v2270_v56 = vld [vmem:[#allocation5 + $0x310] sm:$0xf]  ;;  %v2563_v57 = vld [vmem:[#allocation5 + $0x314] sm:$0xf0]  ;;  %v2529_v60 = vld [vmem:[#allocation5 + $0x204] sm:$0xf0]  ;;  %v2207_v1 = vor.u32 %v2547_v55, %v2206_v54 }
  0x74   : > { %1258 = vmatpush.bf16.msrb.mxu3 %v1931_v5  ;;  %1217 = vmatpush.bf16.msrb.mxu0 %v2175_v9  ;;  %v2198_v62 = vld [vmem:[#allocation5 + $0x280] sm:$0xf]  ;;  %v2545_v63 = vld [vmem:[#allocation5 + $0x284] sm:$0xf0]  ;;  %v2466_v4 = vld [vmem:[#allocation5 + $0x14] sm:$0xf]  ;;  %v2271_v6 = vor.u32 %v2563_v57, %v2270_v56  ;;  %v2135_v19 = vor.u32 %v2529_v60, %v2134_v59 }
  0x75   : > { %1231 = vmatpush.bf16.msrb.mxu1 %v2239_v10  ;;  %v2262_v2 = vld [vmem:[#allocation5 + $0x300] sm:$0xf]  ;;  %v2561_v3 = vld [vmem:[#allocation5 + $0x304] sm:$0xf0]  ;;  %v1888_v5 = vld [vmem:[#allocation5 + $0x18] sm:$0xf0] }
  0x76   : > { %1245 = vmatpush.bf16.msrb.mxu2 %v2303_v14  ;;  %v2494_v7 = vld [vmem:[#allocation5 + $0xf4] sm:$0xf]  ;;  %v2000_v9 = vld [vmem:[#allocation5 + $0xf8] sm:$0xf0]  ;;  %v1866_v12 = vld [vmem:[%s3164_s3 + $0x10] sm:$0xf]  ;;  %v1891_v14 = vor.u32 %v2466_v4, %v1888_v5  ;;  %v2263_v25 = vor.u32 %v2561_v3, %v2262_v2 }
  0x77   : > { %v2510_v10 = vld [vmem:[#allocation5 + $0x174] sm:$0xf]  ;;  %v2064_v11 = vld [vmem:[#allocation5 + $0x178] sm:$0xf0]  ;;  %v1874_v15 = vld [vmem:[%s3164_s3 + $0x18] sm:$0xf]  ;;  %v2003_v26 = vor.u32 %v2494_v7, %v2000_v9 }
  0x78   : > { %1259 = vmatpush.bf16.msrb.mxu3 %v1923_v21  ;;  %1218 = vmatpush.bf16.msrb.mxu0 %v2167_v22  ;;  %v2462_v13 = vld [vmem:[%s3164_s3 + $0x28] sm:$0xf0]  ;;  %v2463_v16 = vld [vmem:[%s3164_s3 + $0x30] sm:$0xf0]  ;;  %v2199_v21 = vor.u32 %v2545_v63, %v2198_v62  ;;  %v1992_v29 = vld [vmem:[#allocation5 + $0xe8] sm:$0xf0]  ;;  %v2067_v30 = vor.u32 %v2510_v10, %v2064_v11 }
  0x79   : > { %1232 = vmatpush.bf16.msrb.mxu1 %v2231_v23  ;;  %v2526_v17 = vld [vmem:[#allocation5 + $0x1f4] sm:$0xf]  ;;  %v2128_v18 = vld [vmem:[#allocation5 + $0x1f8] sm:$0xf0]  ;;  %v1868_v23 = vld [vmem:[%s3164_s3 + $0x2c] sm:$0xf0]  ;;  %v3212_v40 = vor.u32 %v2463_v16, %v1874_v15 }
  0x7a   : > { %1246 = vmatpush.bf16.msrb.mxu2 %v2295_v27  ;;  %v2459_v22 = vld [vmem:[%s3164_s3 + $0x14] sm:$0xf]  ;;  %v1880_v27 = vld [vmem:[#allocation5 + $0x8] sm:$0xf0]  ;;  %v2131_v31 = vor.u32 %v2526_v17, %v2128_v18  ;;  %v2490_v44 = vld [vmem:[#allocation5 + $0xd4] sm:$0xf] }
  0x7b   : > { %v2464_v24 = vld [vmem:[#allocation5 + $0x4] sm:$0xf]  ;;  %v3210_v36 = vor.u32 %v2459_v22, %v1868_v23  ;;  %v2056_v37 = vld [vmem:[#allocation5 + $0x168] sm:$0xf0]  ;;  %v2506_v48 = vld [vmem:[#allocation5 + $0x154] sm:$0xf] }
  0x7c   : > { %1260 = vmatpush.bf16.msrb.mxu3 %v1915_v33  ;;  %1219 = vmatpush.bf16.msrb.mxu0 %v2159_v34  ;;  %v2492_v28 = vld [vmem:[#allocation5 + $0xe4] sm:$0xf]  ;;  %v2542_v33 = vld [vmem:[#allocation5 + $0x274] sm:$0xf]  ;;  %v2192_v34 = vld [vmem:[#allocation5 + $0x278] sm:$0xf0]  ;;  %v1883_v41 = vor.u32 %v2464_v24, %v1880_v27 }
  0x7d   : > { %1233 = vmatpush.bf16.msrb.mxu1 %v2223_v35  ;;  %v2508_v32 = vld [vmem:[#allocation5 + $0x164] sm:$0xf]  ;;  %v3208_v35 = vor.u32 %v2462_v13, %v1866_v12  ;;  %v1995_v42 = vor.u32 %v2492_v28, %v1992_v29  ;;  %v2195_v43 = vor.u32 %v2542_v33, %v2192_v34  ;;  %v2184_v50 = vld [vmem:[#allocation5 + $0x268] sm:$0xf0]  ;;  %v2522_v52 = vld [vmem:[#allocation5 + $0x1d4] sm:$0xf] }
  0x7e   : > { %1247 = vmatpush.bf16.msrb.mxu2 %v2287_v39  ;;  %v2524_v38 = vld [vmem:[#allocation5 + $0x1e4] sm:$0xf]  ;;  %v2120_v39 = vld [vmem:[#allocation5 + $0x1e8] sm:$0xf0]  ;;  %v2112_v54 = vld [vmem:[#allocation5 + $0x1d8] sm:$0xf0] }
  0x7f   : > { %v2540_v49 = vld [vmem:[#allocation5 + $0x264] sm:$0xf]  ;;  %v2115_v60 = vor.u32 %v2522_v52, %v2112_v54  ;;  %v2538_v63 = vld [vmem:[#allocation5 + $0x254] sm:$0xf]  ;;  %v2104_v3 = vld [vmem:[#allocation5 + $0x1c8] sm:$0xf0] }
  0x80   : > { %1261 = vmatpush.bf16.msrb.mxu3 %v1907_v45  ;;  %1220 = vmatpush.bf16.msrb.mxu0 %v2151_v46  ;;  %v1984_v45 = vld [vmem:[#allocation5 + $0xd8] sm:$0xf0]  ;;  %v2059_v46 = vor.u32 %v2508_v32, %v2056_v37  ;;  %v2187_v56 = vor.u32 %v2540_v49, %v2184_v50  ;;  %v2488_v57 = vld [vmem:[#allocation5 + $0xc4] sm:$0xf]  ;;  %v2502_v11 = vld [vmem:[#allocation5 + $0x134] sm:$0xf] }
  0x81   : > { %1234 = vmatpush.bf16.msrb.mxu1 %v2215_v47  ;;  %v2123_v47 = vor.u32 %v2524_v38, %v2120_v39  ;;  %v1987_v55 = vor.u32 %v2490_v44, %v1984_v45  ;;  %v2504_v62 = vld [vmem:[#allocation5 + $0x144] sm:$0xf]  ;;  %v1968_v7 = vld [vmem:[#allocation5 + $0xb8] sm:$0xf0]  ;;  %v2168_v13 = vld [vmem:[#allocation5 + $0x248] sm:$0xf0] }
  0x82   : > { %1248 = vmatpush.bf16.msrb.mxu2 %v2279_v51  ;;  %v2048_v51 = vld [vmem:[#allocation5 + $0x158] sm:$0xf0]  ;;  %v2520_v2 = vld [vmem:[#allocation5 + $0x1c4] sm:$0xf]  ;;  %v2518_v15 = vld [vmem:[#allocation5 + $0x1b4] sm:$0xf] }
  0x83   : > { %v2051_v59 = vor.u32 %v2506_v48, %v2048_v51  ;;  %v2107_v10 = vor.u32 %v2520_v2, %v2104_v3  ;;  %v2536_v12 = vld [vmem:[#allocation5 + $0x244] sm:$0xf]  ;;  %v2096_v16 = vld [vmem:[#allocation5 + $0x1b8] sm:$0xf0]  ;;  %v1960_v18 = vld [vmem:[#allocation5 + $0xa8] sm:$0xf0] }
  0x84   : > { %1262 = vmatpush.bf16.msrb.mxu3 %v1899_v58  ;;  %1221 = vmatpush.bf16.msrb.mxu0 %v2143_v0  ;;  %v1976_v58 = vld [vmem:[#allocation5 + $0xc8] sm:$0xf0]  ;;  %v2176_v0 = vld [vmem:[#allocation5 + $0x258] sm:$0xf0]  ;;  %v2484_v17 = vld [vmem:[#allocation5 + $0xa4] sm:$0xf] }
  0x85   : > { %1235 = vmatpush.bf16.msrb.mxu1 %v2207_v1  ;;  %v2040_v1 = vld [vmem:[#allocation5 + $0x148] sm:$0xf0]  ;;  %v1979_v4 = vor.u32 %v2488_v57, %v1976_v58  ;;  %v2179_v5 = vor.u32 %v2538_v63, %v2176_v0  ;;  %v2534_v23 = vld [vmem:[#allocation5 + $0x234] sm:$0xf]  ;;  %v2516_v27 = vld [vmem:[#allocation5 + $0x1a4] sm:$0xf]  ;;  %v1963_v29 = vor.u32 %v2484_v17, %v1960_v18 }
  0x86   : > { %1249 = vmatpush.bf16.msrb.mxu2 %v2271_v6  ;;  %v2486_v6 = vld [vmem:[#allocation5 + $0xb4] sm:$0xf]  ;;  %v2043_v9 = vor.u32 %v2504_v62, %v2040_v1  ;;  %v2024_v22 = vld [vmem:[#allocation5 + $0x128] sm:$0xf0]  ;;  %v1952_v32 = vld [vmem:[#allocation5 + $0x98] sm:$0xf0] }
  0x87   : > { %v2088_v28 = vld [vmem:[#allocation5 + $0x1a8] sm:$0xf0]  ;;  %v2498_v37 = vld [vmem:[#allocation5 + $0x114] sm:$0xf]  ;;  %v2532_v38 = vld [vmem:[#allocation5 + $0x224] sm:$0xf] }
  0x88   : > { %1263 = vmatpush.bf16.msrb.mxu3 %v1891_v14  ;;  %1222 = vmatpush.bf16.msrb.mxu0 %v2135_v19  ;;  %v2032_v14 = vld [vmem:[#allocation5 + $0x138] sm:$0xf0]  ;;  %v2171_v19 = vor.u32 %v2536_v12, %v2168_v13  ;;  %v2091_v34 = vor.u32 %v2516_v27, %v2088_v28  ;;  %v2152_v39 = vld [vmem:[#allocation5 + $0x228] sm:$0xf0]  ;;  %v2496_v48 = vld [vmem:[#allocation5 + $0x104] sm:$0xf] }
  0x89   : > { %1236 = vmatpush.bf16.msrb.mxu1 %v2199_v21  ;;  %v2500_v21 = vld [vmem:[#allocation5 + $0x124] sm:$0xf]  ;;  %v2035_v24 = vor.u32 %v2502_v11, %v2032_v14  ;;  %v2155_v45 = vor.u32 %v2532_v38, %v2152_v39  ;;  %v2008_v51 = vld [vmem:[#allocation5 + $0x108] sm:$0xf0]  ;;  %v2530_v52 = vld [vmem:[#allocation5 + $0x214] sm:$0xf] }
  0x8a   : > { %1250 = vmatpush.bf16.msrb.mxu2 %v2263_v25  ;;  %v2099_v25 = vor.u32 %v2518_v15, %v2096_v16  ;;  %v2027_v33 = vor.u32 %v2500_v21, %v2024_v22  ;;  %v2144_v54 = vld [vmem:[#allocation5 + $0x218] sm:$0xf0]  ;;  %v2574_v57 = vld [vmem:[#allocation5 + $0x374] sm:$0xf]  ;;  %v2011_v0 = vor.u32 %v2496_v48, %v2008_v51  ;;  %v2528_v2 = vld [vmem:[#allocation5 + $0x204] sm:$0xf] }
  0x8b   : > { %1223 = vmatmul.bf16.vlgmr.msrb.gmra.mxu0 %v3208_v35  ;;  %v2320_v58 = vld [vmem:[#allocation5 + $0x378] sm:$0xf0]  ;;  %v2147_v63 = vor.u32 %v2530_v52, %v2144_v54  ;;  %v2136_v3 = vld [vmem:[#allocation5 + $0x208] sm:$0xf0]  ;;  %v2554_v14 = vld [vmem:[#allocation5 + $0x2d4] sm:$0xf] }
  0x8c   : > { %1271 = vmatpush.bf16.msra.mxu0 %v2003_v26  ;;  %1237 = vmatmul.bf16.vlgmr.msrb.gmra.mxu1 %v3210_v36  ;;  %v2160_v26 = vld [vmem:[#allocation5 + $0x238] sm:$0xf0]  ;;  %v2139_v11 = vor.u32 %v2528_v2, %v2136_v3  ;;  %v2570_v16 = vld [vmem:[#allocation5 + $0x354] sm:$0xf]  ;;  %v2232_v21 = vld [vmem:[#allocation5 + $0x2c8] sm:$0xf0] }
  0x8d   : > { %1285 = vmatpush.bf16.msra.mxu1 %v2067_v30  ;;  %1251 = vmatmul.bf16.vlgmr.msrb.gmra.mxu2 %v3212_v40  ;;  %v2163_v30 = vor.u32 %v2534_v23, %v2160_v26  ;;  %v2240_v15 = vld [vmem:[#allocation5 + $0x2d8] sm:$0xf0]  ;;  %v2568_v22 = vld [vmem:[#allocation5 + $0x344] sm:$0xf]  ;;  %v2296_v23 = vld [vmem:[#allocation5 + $0x348] sm:$0xf0] }
  0x8e   : > { %1299 = vmatpush.bf16.msra.mxu2 %v2131_v31  ;;  %1264 = vmatpush.bf16.msrb.mxu3 %v1883_v41  ;;  %v2482_v31 = vld [vmem:[#allocation5 + $0x94] sm:$0xf]  ;;  %v2016_v41 = vld [vmem:[#allocation5 + $0x118] sm:$0xf0]  ;;  %v2243_v18 = vor.u32 %v2554_v14, %v2240_v15  ;;  %v2581_v51 = vld [vmem:[#allocation8 + $0x28] sm:$0xff]  ;;  %s1847_s27 = sshll.u32 %s3160_s5, 4 }
  0x8f   : > { %v1955_v44 = vor.u32 %v2482_v31, %v1952_v32  ;;  %v2019_v49 = vor.u32 %v2498_v37, %v2016_v41  ;;  %v2304_v17 = vld [vmem:[#allocation5 + $0x358] sm:$0xf0]  ;;  %v2566_v27 = vld [vmem:[#allocation5 + $0x334] sm:$0xf]  ;;  %v2564_v31 = vld [vmem:[#allocation5 + $0x324] sm:$0xf] }
  0x90   : > { %1272 = vmatpush.bf16.msra.mxu0 %v1995_v42  ;;  %v2514_v42 = vld [vmem:[#allocation5 + $0x194] sm:$0xf]  ;;  %v2224_v26 = vld [vmem:[#allocation5 + $0x2b8] sm:$0xf0]  ;;  %v2280_v32 = vld [vmem:[#allocation5 + $0x328] sm:$0xf0] }
  0x91   : > { %1286 = vmatpush.bf16.msra.mxu1 %v2059_v46  ;;  %1265 = vmatmul.bf16.vlgmr.msrb.gmra.mxu3 %v3184_v53  ;;  %v1971_v53 = vor.u32 %v2486_v6, %v1968_v7  ;;  %v2480_v46 = vld [vmem:[#allocation5 + $0x84] sm:$0xf]  ;;  %v2248_v7 = vld [vmem:[#allocation5 + $0x2e8] sm:$0xf0]  ;;  %v2208_v37 = vld [vmem:[#allocation5 + $0x298] sm:$0xf0] }
  0x92   : > { %1313 = vmatpush.bf16.msra.mxu3 %v2195_v43  ;;  %1300 = vmatpush.bf16.msra.mxu2 %v2123_v47  ;;  %v2080_v43 = vld [vmem:[#allocation5 + $0x198] sm:$0xf0]  ;;  %v1944_v47 = vld [vmem:[#allocation5 + $0x88] sm:$0xf0]  ;;  %v2556_v6 = vld [vmem:[#allocation5 + $0x2e4] sm:$0xf] }
  0x93   : > { %v2083_v50 = vor.u32 %v2514_v42, %v2080_v43  ;;  %v1947_v62 = vor.u32 %v2480_v46, %v1944_v47  ;;  %v2251_v12 = vor.u32 %v2556_v6, %v2248_v7  ;;  %v2562_v38 = vld [vmem:[#allocation5 + $0x314] sm:$0xf]  ;;  %v2272_v39 = vld [vmem:[#allocation5 + $0x318] sm:$0xf0]  ;;  %v2544_v43 = vld [vmem:[#allocation5 + $0x284] sm:$0xf] }
  0x94   : > { %1273 = vmatpush.bf16.msra.mxu0 %v1987_v55  ;;  %v2558_v55 = vld [vmem:[#allocation5 + $0x2f4] sm:$0xf]  ;;  %v2275_v42 = vor.u32 %v2562_v38, %v2272_v39  ;;  %v2264_v46 = vld [vmem:[#allocation5 + $0x308] sm:$0xf0]  ;;  %v2580_v52 = vld [vmem:[#allocation8 + $0x20] sm:$0xff]  ;;  %s2608_s20 = sshll.u32 %s3067_s16, 4 }
  0x95   : > { %1287 = vmatpush.bf16.msra.mxu1 %v2051_v59  ;;  %v2512_v59 = vld [vmem:[#allocation5 + $0x184] sm:$0xf]  ;;  %v2579_v54 = vld [vmem:[#allocation8 + $0x18] sm:$0xff]  ;;  %s1705_s26 = scalar_lea.hbm %s3276_s9, %s2608_s20  ;;  %s434_s25 = scalar_lea.vmem [#allocation13], %s1847_s27 }
  0x96   : > { %1314 = vmatpush.bf16.msra.mxu3 %v2187_v56  ;;  %1301 = vmatpush.bf16.msra.mxu2 %v2115_v60  ;;  %v2256_v56 = vld [vmem:[#allocation5 + $0x2f8] sm:$0xf0]  ;;  %v2072_v60 = vld [vmem:[#allocation5 + $0x188] sm:$0xf0]  ;;  %s1706_s29 = sshll.u32 %s434_s25, 4  ;;  %s1708_s19 = sshll.u32 %s1705_s26, 4  ;;  %s1707_s29 = int_to_ptr.vmem [resolvable:$true] %s1706_s29  ;;  %s1709_s19 = int_to_ptr.hbm [resolvable:$true] %s1708_s19 }
  0x97   : > { %v2259_v1 = vor.u32 %v2558_v55, %v2256_v56  ;;  %v2578_v55 = vld [vmem:[#allocation8 + $0x10] sm:$0xff]  ;;  %s1694_s7 = scalar_lea.sflag [#allocation4], %s3160_s5  ;;  %s2914_s2 = sshra.s32 %s1709_s19, 4  ;;  %s2915_s2 = int_to_ptr.hbm [resolvable:$true] %s2914_s2 }
  0x98   : > { %1274 = vmatpush.bf16.msra.mxu0 %v1979_v4  ;;  %v2323_v4 = vor.u32 %v2574_v57, %v2320_v58  ;;  %v2577_v58 = vld [vmem:[#allocation8 + $0x8] sm:$0xff]  ;;  %s2916_s16 = scalar_lea.hbm %s2915_s2, 16  ;;  %s2920_s24 = scalar_lea.hbm %s3276_s9, 32 }
  0x99   : > { %1288 = vmatpush.bf16.msra.mxu1 %v2043_v9  ;;  %v2572_v9 = vld [vmem:[#allocation5 + $0x364] sm:$0xf]  ;;  %p2917_p1 = scmp.ne.s32.totalorder %s2915_s2, %s2916_s16  ;;  %p2921_p13 = scmp.lt.s32.totalorder %s2915_s2, %s3276_s9 }
  0x9a   : > { %1315 = vmatpush.bf16.msra.mxu3 %v2179_v5  ;;  %1302 = vmatpush.bf16.msra.mxu2 %v2107_v10  ;;  %v2075_v5 = vor.u32 %v2512_v59, %v2072_v60  ;;  %v2312_v10 = vld [vmem:[#allocation5 + $0x368] sm:$0xf0]  ;;  %v557_v59 = vld [vmem:[#allocation7] sm:$0x3]  ;;  %p2922_p8 = scmp.lt.s32.totalorder %s2920_s24, %s2916_s16 }
  0x9b   : > { %v2315_v13 = vor.u32 %v2572_v9, %v2312_v10  ;;  %v559_v60 = vperm.slane %v557_v59, 0  ;;  %p2918_p3 = pnand %p2917_p1, %p3129_p0 }
  0x9c   : > { %1275 = vmatpush.bf16.msra.mxu0 %v1971_v53  ;;  %v2307_v53 = vor.u32 %v2570_v16, %v2304_v17  ;;  %v2591_v17 = vld [vmem:[#allocation8 + $0x78] sm:$0xff]  ;;  %p2923_p7 = por %p2922_p8, %p2921_p13 }
  0x9d   : > { %1289 = vmatpush.bf16.msra.mxu1 %v2035_v24  ;;  %p2919_p5 = pneg %p2918_p3 }
  0x9e   : > { %1316 = vmatpush.bf16.msra.mxu3 %v2171_v19  ;;  %1303 = vmatpush.bf16.msra.mxu2 %v2099_v25  ;;  %v2552_v19 = vld [vmem:[#allocation5 + $0x2c4] sm:$0xf]  ;;  %v2550_v25 = vld [vmem:[#allocation5 + $0x2b4] sm:$0xf] }
  0x9f   : > { %v2235_v24 = vor.u32 %v2552_v19, %v2232_v21  ;;  %v2227_v28 = vor.u32 %v2550_v25, %v2224_v26  ;;  %v2589_v25 = vld [vmem:[#allocation8 + $0x68] sm:$0xff]  ;;  %p2924_p9 = pnand %p2923_p7, %p2919_p5 }
  0xa0   : > { %1276 = vmatpush.bf16.msra.mxu0 %v1963_v29  ;;  %v2548_v29 = vld [vmem:[#allocation5 + $0x2a4] sm:$0xf] }
  0xa1   : > { %1290 = vmatpush.bf16.msra.mxu1 %v2027_v33  ;;  %v2283_v33 = vor.u32 %v2564_v31, %v2280_v32  ;;  %v2585_v31 = vld [vmem:[#allocation8 + $0x48] sm:$0xff]  ;;  %v2584_v32 = vld [vmem:[#allocation8 + $0x40] sm:$0xff] }
  0xa2   : > { %1317 = vmatpush.bf16.msra.mxu3 %v2163_v30  ;;  %1304 = vmatpush.bf16.msra.mxu2 %v2091_v34  ;;  %v2216_v30 = vld [vmem:[#allocation5 + $0x2a8] sm:$0xf0]  ;;  %v2546_v34 = vld [vmem:[#allocation5 + $0x294] sm:$0xf] }
  0xa3   : > { %v2211_v41 = vor.u32 %v2546_v34, %v2208_v37 }
  0xa4   : > { %1277 = vmatpush.bf16.msra.mxu0 %v1955_v44  ;;  %v2200_v44 = vld [vmem:[#allocation5 + $0x288] sm:$0xf0] }
  0xa5   : > { %1291 = vmatpush.bf16.msra.mxu1 %v2019_v49  ;;  %v2203_v47 = vor.u32 %v2544_v43, %v2200_v44  ;;  %v2583_v49 = vld [vmem:[#allocation8 + $0x38] sm:$0xff] }
  0xa6   : > { %1318 = vmatpush.bf16.msra.mxu3 %v2155_v45  ;;  %1305 = vmatpush.bf16.msra.mxu2 %v2083_v50  ;;  %v2560_v45 = vld [vmem:[#allocation5 + $0x304] sm:$0xf]  ;;  %v2582_v50 = vld [vmem:[#allocation8 + $0x30] sm:$0xff] }
  0xa7   : > { %v2267_v48 = vor.u32 %v2560_v45, %v2264_v46 }
  0xa8   : > { %1278 = vmatpush.bf16.msra.mxu0 %v1947_v62 }
  0xa9   : > { %1292 = vmatpush.bf16.msra.mxu1 %v2011_v0 }
  0xaa   : > { %1319 = vmatpush.bf16.msra.mxu3 %v2147_v63  ;;  %1306 = vmatpush.bf16.msra.mxu2 %v2075_v5 }
  0xab   : > { %1279 = vmatmul.bf16.vlgmr.msra.gmra.mxu0 %v3194_v8  ;;  %v2299_v8 = vor.u32 %v2568_v22, %v2296_v23 }
  0xac   : > { %1327 = vmatpush.bf16.msrb.mxu0 %v2259_v1  ;;  %1293 = vmatmul.bf16.vlgmr.msra.gmra.mxu1 %v3188_v61  ;;  %v2288_v61 = vld [vmem:[#allocation5 + $0x338] sm:$0xf0] }
  0xad   : > { %1341 = vmatpush.bf16.msrb.mxu1 %v2323_v4  ;;  %1307 = vmatmul.bf16.vlgmr.msra.gmra.mxu2 %v3199_v20  ;;  %v2291_v20 = vor.u32 %v2566_v27, %v2288_v61 }
  0xae   : > { %1320 = vmatpush.bf16.msra.mxu3 %v2139_v11  ;;  %1493 = vmatpush.bf16.msrb.mxu2 %v2583_v49 }
  0xb0   : > { %1328 = vmatpush.bf16.msrb.mxu0 %v2251_v12 }
  0xb1   : > { %1342 = vmatpush.bf16.msrb.mxu1 %v2315_v13  ;;  %1321 = vmatmul.bf16.vlgmr.msra.gmra.mxu3 %v3208_v35  ;;  %v2219_v35 = vor.u32 %v2548_v29, %v2216_v30  ;;  %v2586_v29 = vld [vmem:[#allocation8 + $0x50] sm:$0xff] }
  0xb2   : > { %1494 = vmatpush.bf16.msrb.mxu2 %v2582_v50  ;;  %1507 = vmatpush.bf16.msrb.mxu3 %v2591_v17  ;;  %v2717_v17 = vld [vmem:[%s3271_s4] ss:$0 sm:$0xff] }
  0xb4   : > { %1329 = vmatpush.bf16.msrb.mxu0 %v2243_v18 }
  0xb5   : > { %1343 = vmatpush.bf16.msrb.mxu1 %v2307_v53 }
  0xb6   : > { %1495 = vmatpush.bf16.msrb.mxu2 %v2581_v51 }
  0xb8   : > { %1330 = vmatpush.bf16.msrb.mxu0 %v2235_v24  ;;  %v2590_v24 = vld [vmem:[#allocation8 + $0x70] sm:$0xff] }
  0xb9   : > { %1344 = vmatpush.bf16.msrb.mxu1 %v2299_v8  ;;  %1508 = vmatpush.bf16.msrb.mxu3 %v2590_v24 }
  0xba   : > { %1496 = vmatpush.bf16.msrb.mxu2 %v2580_v52 }
  0xbc   : > { %1331 = vmatpush.bf16.msrb.mxu0 %v2227_v28  ;;  %v2588_v28 = vld [vmem:[#allocation8 + $0x60] sm:$0xff] }
  0xbd   : > { %1345 = vmatpush.bf16.msrb.mxu1 %v2291_v20  ;;  %1509 = vmatpush.bf16.msrb.mxu3 %v2589_v25  ;;  %v2587_v20 = vld [vmem:[#allocation8 + $0x58] sm:$0xff] }
  0xbe   : > { %1497 = vmatpush.bf16.msrb.mxu2 %v2579_v54 }
  0xc0   : > { %1332 = vmatpush.bf16.msrb.mxu0 %v2219_v35 }
  0xc1   : > { %1346 = vmatpush.bf16.msrb.mxu1 %v2283_v33  ;;  %1510 = vmatpush.bf16.msrb.mxu3 %v2588_v28  ;;  %v560_v33 = vperm.slane %v557_v59, 1  ;;  %v2600_v28 = vld [vmem:[#allocation11] sm:$0xff] }
  0xc2   : > { %1498 = vmatpush.bf16.msrb.mxu2 %v2578_v55 }
  0xc4   : > { %1333 = vmatpush.bf16.msrb.mxu0 %v2211_v41 }
  0xc5   : > { %1347 = vmatpush.bf16.msrb.mxu1 %v2275_v42  ;;  %1511 = vmatpush.bf16.msrb.mxu3 %v2587_v20 }
  0xc6   : > { %1499 = vmatpush.bf16.msrb.mxu2 %v2577_v58 }
  0xc8   : > { %1334 = vmatpush.bf16.msrb.mxu0 %v2203_v47 }
  0xc9   : > { %1348 = vmatpush.bf16.msrb.mxu1 %v2267_v48  ;;  %1512 = vmatpush.bf16.msrb.mxu3 %v2586_v29  ;;  %v2718_v29 = vld [vmem:[%s3273_s6] ss:$0 sm:$0xff] }
  0xcb   : > { %1335 = vmatmul.bf16.vlgmr.msrb.gmra.mxu0 %v3210_v36  ;;  %v2576_v36 = vld [vmem:[#allocation8] sm:$0xff] }
  0xcc   : > { %1349 = vmatmul.bf16.vlgmr.msrb.gmra.mxu1 %v3212_v40  ;;  %1500 = vmatpush.bf16.msrb.mxu2 %v2576_v36 }
  0xcd   : > { %1513 = vmatpush.bf16.msrb.mxu3 %v2585_v31 }
  0xd1   : > { %1514 = vmatpush.bf16.msrb.mxu3 %v2584_v32 }
  0xe8   : > { %v1168_v56 = vpop.f32.mrf.mxu0 }
  0xe9   : > { %v1169_v62 = vadd.f32 %v1168_v56, %v559_v60 }
  0xeb   : > { %v1182_v57 = vpop.f32.mrf.mxu1 }
  0xec   : > { %v1183_v1 = vadd.f32 %v1182_v57, %v1169_v62 }
  0xf0   : > { %v1196_v40 = vpop.f32.mrf.mxu2  ;;  %v1170_v63 = vpop.f32.mrf.mxu0 }
  0xf1   : > { %v1171_v3 = vadd.f32 %v1170_v63, %v559_v60  ;;  %v1197_v5 = vadd.f32 %v1196_v40, %v1183_v1 }
  0xf2   : > { %v1210_v2 = vpop.f32.mrf.mxu3 }
  0xf3   : > { %v1184_v0 = vpop.f32.mrf.mxu1  ;;  %v1211_v10 = vadd.f32 %v1210_v2, %v1197_v5  ;;  %v2599_v2 = vld [vmem:[#allocation10 + $0x38] sm:$0xff]  ;;  %v2596_v5 = vld [vmem:[#allocation10 + $0x20] sm:$0xff] }
  0xf4   : > { %v1185_v6 = vadd.f32 %v1184_v0, %v1171_v3  ;;  %1592 = vmatpush.bf16.msra.mxu0 %v2599_v2  ;;  %v2598_v3 = vld [vmem:[#allocation10 + $0x30] sm:$0xff] }
  0xf8   : > { %v1198_v4 = vpop.f32.mrf.mxu2  ;;  %1593 = vmatpush.bf16.msra.mxu0 %v2598_v3 }
  0xf9   : > { %v1199_v11 = vadd.f32 %v1198_v4, %v1185_v6  ;;  %v2597_v4 = vld [vmem:[#allocation10 + $0x28] sm:$0xff]  ;;  %v2595_v6 = vld [vmem:[#allocation10 + $0x18] sm:$0xff] }
  0xfa   : > { %v1212_v12 = vpop.f32.mrf.mxu3 }
  0xfb   : > { %v1213_v15 = vadd.f32 %v1212_v12, %v1199_v11  ;;  %v2607_v11 = vld [vmem:[#allocation11 + $0x38] sm:$0xff]  ;;  %v2606_v12 = vld [vmem:[#allocation11 + $0x30] sm:$0xff] }
  0xfc   : > { %1594 = vmatpush.bf16.msra.mxu0 %v2597_v4  ;;  %1677 = vmatpush.bf16.msra.mxu1 %v2607_v11 }
 0x100   : > { %1595 = vmatpush.bf16.msra.mxu0 %v2596_v5  ;;  %1678 = vmatpush.bf16.msra.mxu1 %v2606_v12 }
 0x104   : > { %1596 = vmatpush.bf16.msra.mxu0 %v2595_v6 }
 0x108   : > { %v1224_v7 = vpop.f32.mrf.mxu0 }
 0x109   : > { %v1238_v9 = vpop.f32.mrf.mxu1  ;;  %v1225_v13 = vadd.f32 %v1224_v7, %v1211_v10  ;;  %v2594_v7 = vld [vmem:[#allocation10 + $0x10] sm:$0xff]  ;;  %v2592_v10 = vld [vmem:[#allocation10] sm:$0xff] }
 0x10a   : > { %1597 = vmatpush.bf16.msra.mxu0 %v2594_v7 }
 0x10b   : > { %v1239_v18 = vadd.f32 %v1238_v9, %v1225_v13  ;;  %v2593_v9 = vld [vmem:[#allocation10 + $0x8] sm:$0xff] }
 0x10c   : > { %v2605_v13 = vld [vmem:[#allocation11 + $0x28] sm:$0xff] }
 0x10d   : > { %1679 = vmatpush.bf16.msra.mxu1 %v2605_v13 }
 0x10e   : > { %1598 = vmatpush.bf16.msra.mxu0 %v2593_v9 }
 0x110   : > { %v1252_v14 = vpop.f32.mrf.mxu2  ;;  %v1226_v16 = vpop.f32.mrf.mxu0 }
 0x111   : > { %v1227_v53 = vadd.f32 %v1226_v16, %v1213_v15  ;;  %v1240_v19 = vpop.f32.mrf.mxu1  ;;  %v1253_v21 = vadd.f32 %v1252_v14, %v1239_v18  ;;  %v2604_v14 = vld [vmem:[#allocation11 + $0x20] sm:$0xff] }
 0x112   : > { %1599 = vmatpush.bf16.msra.mxu0 %v2592_v10  ;;  %1680 = vmatpush.bf16.msra.mxu1 %v2604_v14 }
 0x113   : > { %v1241_v22 = vadd.f32 %v1240_v19, %v1227_v53  ;;  %v1355_v26 = vmax.f32 %v1253_v21, 0.0 }
 0x114   : > { %v1266_v30 = vpop.f32.mrf.mxu3 }
 0x115   : > { %v1267_v38 = vadd.f32 %v1266_v30, %v560_v33 }
 0x118   : > { %v1254_v23 = vpop.f32.mrf.mxu2 }
 0x119   : > { %v1255_v8 = vadd.f32 %v1254_v23, %v1241_v22 }
 0x11b   : > { %v1357_v27 = vmax.f32 %v1255_v8, 0.0 }
 0x11c   : > { %v1268_v37 = vpop.f32.mrf.mxu3 }
 0x11d   : > { %v1359_v61 = vpack.c.bf16 %v1357_v27, %v1355_v26  ;;  %v1269_v41 = vadd.f32 %v1268_v37, %v560_v33  ;;  %v2603_v26 = vld [vmem:[#allocation11 + $0x18] sm:$0xff]  ;;  %v2602_v27 = vld [vmem:[#allocation11 + $0x10] sm:$0xff]  ;;  %v2719_v37 = vld [vmem:[%s3275_s8] ss:$0 sm:$0xff] }
 0x11e   : > { %1681 = vmatpush.bf16.msra.mxu1 %v2603_v26 }
 0x11f   : > { %1501 = vmatmul.bf16.vlgmr.msrb.gmra.mxu2 %v1359_v61  ;;  %v2601_v61 = vld [vmem:[#allocation11 + $0x8] sm:$0xff] }
 0x122   : > { %1682 = vmatpush.bf16.msra.mxu1 %v2602_v27 }
 0x126   : > { %1683 = vmatpush.bf16.msra.mxu1 %v2601_v61 }
 0x128   : > { %v1280_v35 = vpop.f32.mrf.mxu0 }
 0x129   : > { %v1294_v34 = vpop.f32.mrf.mxu1  ;;  %v1281_v42 = vadd.f32 %v1280_v35, %v1267_v38 }
 0x12a   : > { %1684 = vmatpush.bf16.msra.mxu1 %v2600_v28 }
 0x12b   : > { %v1295_v46 = vadd.f32 %v1294_v34, %v1281_v42 }
 0x130   : > { %v1308_v39 = vpop.f32.mrf.mxu2  ;;  %v1282_v43 = vpop.f32.mrf.mxu0 }
 0x131   : > { %v1296_v44 = vpop.f32.mrf.mxu1  ;;  %v1283_v47 = vadd.f32 %v1282_v43, %v1269_v41  ;;  %v1309_v48 = vadd.f32 %v1308_v39, %v1295_v46 }
 0x133   : > { %v1297_v49 = vadd.f32 %v1296_v44, %v1283_v47 }
 0x134   : > { %v1322_v45 = vpop.f32.mrf.mxu3 }
 0x135   : > { %v1323_v54 = vadd.f32 %v1322_v45, %v1309_v48 }
 0x138   : > { %v1310_v50 = vpop.f32.mrf.mxu2 }
 0x139   : > { %v1311_v55 = vadd.f32 %v1310_v50, %v1297_v49 }
 0x13c   : > { %v1324_v56 = vpop.f32.mrf.mxu3 }
 0x13d   : > { %v1325_v58 = vadd.f32 %v1324_v56, %v1311_v55 }
 0x148   : > { %v1336_v51 = vpop.f32.mrf.mxu0 }
 0x149   : > { %v1350_v52 = vpop.f32.mrf.mxu1  ;;  %v1337_v57 = vadd.f32 %v1336_v51, %v1323_v54 }
 0x14b   : > { %v1351_v36 = vadd.f32 %v1350_v52, %v1337_v57 }
 0x14d   : > { %v1356_v63 = vmax.f32 %v1351_v36, 0.0 }
 0x150   : > { %v1338_v59 = vpop.f32.mrf.mxu0 }
 0x151   : > { %v1339_v60 = vadd.f32 %v1338_v59, %v1325_v58  ;;  %v1352_v40 = vpop.f32.mrf.mxu1 }
 0x153   : > { %v1353_v62 = vadd.f32 %v1352_v40, %v1339_v60 }
 0x155   : > { %v1358_v0 = vmax.f32 %v1353_v62, 0.0 }
 0x157   : > { %v1360_v1 = vpack.c.bf16 %v1358_v0, %v1356_v63 }
 0x159   : > { %1515 = vmatmul.bf16.vlgmr.msrb.gmra.mxu3 %v1360_v1 }
 0x1a2   : > { %v1502_v15 = vpop.f32.mrf.mxu2 }
 0x1a3   : > { %v1503_v53 = vadd.f32 %v2717_v17, %v1502_v15 }
 0x1aa   : > { %v1504_v18 = vpop.f32.mrf.mxu2 }
 0x1ab   : > { %v1505_v19 = vadd.f32 %v2717_v17, %v1504_v18 }
 0x1dc   : > { %v1516_v16 = vpop.f32.mrf.mxu3 }
 0x1dd   : > { %v1517_v21 = vadd.f32 %v1516_v16, %v1503_v53 }
 0x1df   : > { %v1521_v24 = vmax.f32 %v1517_v21, 0.0 }
 0x1e4   : > { %v1518_v22 = vpop.f32.mrf.mxu3 }
 0x1e5   : > { %v1519_v23 = vadd.f32 %v1518_v22, %v1505_v19 }
 0x1e7   : > { %v1522_v8 = vmax.f32 %v1519_v23, 0.0 }
 0x1e9   : > { %v1523_v25 = vpack.c.bf16 %v1522_v8, %v1521_v24 }
 0x1eb   : > { %1600 = vmatmul.bf16.vlgmr.msra.gmra.mxu0 %v1523_v25 }
 0x268   : > { %v1601_v20 = vpop.f32.mrf.mxu0 }
 0x269   : > { %v1602_v30 = vadd.f32 %v2718_v29, %v1601_v20 }
 0x26b   : > { %v1606_v35 = vmax.f32 %v1602_v30, 0.0 }
 0x270   : > { %v1603_v31 = vpop.f32.mrf.mxu0 }
 0x271   : > { %v1604_v32 = vadd.f32 %v2718_v29, %v1603_v31 }
 0x273   : > { %v1607_v33 = vmax.f32 %v1604_v32, 0.0 }
 0x275   : > { %v1608_v34 = vpack.c.bf16 %v1607_v33, %v1606_v35 }
 0x277   : > { %1685 = vmatmul.bf16.vlgmr.msra.gmra.mxu1 %v1608_v34 }
 0x2f4   : > { %v1686_v38 = vpop.f32.mrf.mxu1 }
 0x2f5   : > { %v1687_v39 = vadd.f32 %v2719_v37, %v1686_v38 }
 0x2f7   : > { %1691 = vst [vmem:[%s434_s25] sm:$0xff] %v1687_v39 }
 0x2fc   : > { %v1688_v41 = vpop.f32.mrf.mxu1 }
 0x2fd   : > { %v1689_v42 = vadd.f32 %v2719_v37, %v1688_v41 }
 0x2ff   : > { %1692 = vst [vmem:[%s434_s25 + $0x8] sm:$0xff] %v1689_v42 }
 0x300   : > { %2927 = shalt.err (!%p2924_p9)
}
 0x301   : > { %s2991_s5 = smov 128   ;;  %s2992_s27 = smov 8  }
 0x302   : > { %2634 = dma.vmem_to_hbm [thread:$0]  (%p3129_p0), %s1707_s29, 256, %s1709_s19, %s1694_s7, %s2991_s5, %s2991_s5, %s2992_s27  }
 0x303 PF: > { %s1723_s1 = sand.u32 1, %s2966_s30   ;;  %p3294_p10 = scmp.ge.s32.totalorder %s2978_s12, 2 }
 0x304   : > { %s1724_s13 = scalar_lea.sflag [#allocation4], %s1723_s1 }
 0x305   : > { %p2657_p11 = pnand %p3294_p10, %p3135_p6 }
 0x307   : > { %p2658_p12 = pneg %p2657_p11 }
 0x309   : > { %2961 = dma.done.wait (%p2658_p12), %s1724_s13, 256  }
 0x30a   : > { %2963 = vsyncadd (%p2658_p12), %s1724_s13, 4294967040  ;;  %s3295_s20 = sld [smem:[#allocation19_spill]]  ;;  %p25_p2 = scmp.ge.s32.totalorder %s3109_s18, 4  }
 0x30b   : > { %s3296_s30 = smov %s2970_s10  ;;  %s3297_s10 = smov %s2974_s11 }
 0x30c   : > { %s3299_s12 = smov %s3109_s18  ;;  %27 = sbr.rel (!%p25_p2) target bundleno = 14 (0xe), region = 121 }
 0x310   : > { %s3298_s11 = smov %s3295_s20 }
 0x311   :  { %1730 = vsyncpa [#allocation3], 1 }
 0x312   :  { %1732 = vsyncpa [#allocation3 + $0x1], 1 }
 0x313   :  { %1733 = vsyncpa [#allocation6], 1 }
 0x314   :  { %1734 = vsyncpa [#allocation9], 1 }
 0x315   :  { %1735 = vsyncpa [#allocation12], 1 }
 0x316   :  { %1736 = vsyncpa [#allocation4], 1 }
 0x317   :  { %1738 = vsyncpa [#allocation4 + $0x1], 1 }

</bundles_post_ra>
